<compile_context>
chip_gen: v7x
topology: tpu7x:2x2x1
jax: 0.10.0
libtpu: 0.0.40
codegen_flags: <defaults>
</compile_context>

<pallas_src>
import jax
import jax.numpy as jnp
from jax.experimental import pallas as pl
from jax.experimental.pallas import tpu as pltpu


def _vd_kernel(x_ref, m_ref, o_ref):
    # x_ref: (1, TS, H); m_ref: (1, 1, H) f32, values are exactly 0 or 1/(1-p).
    # Implicit sublane broadcast of the mask across the TS seq positions (VPU only).
    o_ref[...] = (x_ref[...].astype(jnp.float32) * m_ref[...]).astype(o_ref.dtype)


def _make_locked_mask(key, batch, hidden, dropout):
    """(B, 1, H) inverted-dropout mask: Bernoulli(1-p) / (1-p), float32."""
    keep = jax.random.bernoulli(key, p=1.0 - dropout, shape=(batch, 1, hidden))
    return keep.astype(jnp.float32) * jnp.float32(1.0 / (1.0 - dropout))


def _choose_seq_tile(seq, hidden, itemsize, target_bytes=2 << 20):
    """Pick TS so a tile is ~2 MiB and TS is a multiple of 8 (or the whole seq axis)."""
    if seq <= 8:
        return seq
    ts = max(1, target_bytes // max(1, hidden * itemsize))
    ts = max(8, (min(ts, seq) // 8) * 8)
    return min(ts, seq)


def variational_dropout(x, key, dropout=0.1, training=True):
    """JAX/Pallas equivalent of VariationalDropout.forward.  x: (B, S, H)."""
    if not dropout or not training:
        return x

    B, S, H = x.shape
    mask = _make_locked_mask(key, B, H, float(dropout))          # (B, 1, H) f32

    ts = _choose_seq_tile(S, H, x.dtype.itemsize)
    grid = (B, pl.cdiv(S, ts))

    cost = pl.CostEstimate(
        flops=2 * B * S * H,
        transcendentals=0,
        bytes_accessed=2 * B * S * H * x.dtype.itemsize + B * H * 4,
    )

    return pl.pallas_call(
        _vd_kernel,
        out_shape=jax.ShapeDtypeStruct(x.shape, x.dtype),
        grid=grid,
        in_specs=[
            pl.BlockSpec((1, ts, H), lambda b, s: (b, s, 0)),    # x tile
            pl.BlockSpec((1, 1, H), lambda b, s: (b, 0, 0)),     # locked mask (reused across seq tiles)
        ],
        out_specs=pl.BlockSpec((1, ts, H), lambda b, s: (b, s, 0)),
        compiler_params=pltpu.CompilerParams(
            dimension_semantics=("parallel", "parallel"),        # megacore-shardable
            vmem_limit_bytes=64 << 20,
        ),
        cost_estimate=cost,
    )(x, mask)


if __name__ == "__main__":
    root = jax.random.PRNGKey(0)
    x_key, m_key = jax.random.split(root)

    B, S, H = 2, 8, 128  # batch, seq, hidden
    x = jax.random.normal(x_key, (B, S, H), dtype=jnp.float32)
    dropout = 0.25

    out = variational_dropout(x, m_key, dropout=dropout, training=True)
    out = jax.block_until_ready(out)

    # Pure-JAX reference using the identical mask.
    mask = _make_locked_mask(m_key, B, H, dropout)               # (B, 1, H)
    ref = (x.astype(jnp.float32) * mask).astype(x.dtype)

    assert out.shape == x.shape and out.dtype == x.dtype
    assert jnp.allclose(out, ref, atol=1e-6, rtol=1e-6)

    # Locked-dropout semantics: mask values are exactly 0 or 1/(1-p) ...
    scale = 1.0 / (1.0 - dropout)
    assert bool(jnp.all((mask == 0.0) | (jnp.abs(mask - scale) < 1e-6)))
    # ... and a dropped (batch, hidden) lane is zero at EVERY seq position.
    dropped = (mask[:, 0, :] == 0.0)[:, None, :]                 # (B, 1, H)
    assert bool(jnp.all(jnp.where(dropped, out == 0.0, True)))

    # Identity paths (dropout disabled / eval mode).
    assert jnp.array_equal(variational_dropout(x, m_key, dropout=0.0), x)
    assert jnp.array_equal(
        variational_dropout(x, m_key, dropout=dropout, training=False), x)

    print("KERNEL_OK")
</pallas_src>

<mosaic_0001>
module attributes {stable_mosaic.version = 11 : i64} {
  func.func @_vd_kernel(%arg0: i32, %arg1: i32, %arg2: memref<1x8x128xf32, #tpu.memory_space<vmem>>, %arg3: memref<1x1x128xf32, #tpu.memory_space<vmem>>, %arg4: memref<1x8x128xf32, #tpu.memory_space<vmem>>) attributes {dimension_semantics = [#tpu.dimension_semantics<parallel>, #tpu.dimension_semantics<parallel>], iteration_bounds = array<i64: 2, 1>, scalar_prefetch = 0 : i64, scratch_operands = 0 : i64, tpu.core_type = #tpu.core_type<tc>, window_params = [{transform_indices = @transform_0, window_bounds = array<i64: 1, 8, 128>}, {transform_indices = @transform_1, window_bounds = array<i64: 1, 1, 128>}, {transform_indices = @transform_2, window_bounds = array<i64: 1, 8, 128>}]} {
    %c0 = arith.constant 0 : index
    %c0_0 = arith.constant 0 : index
    %c0_1 = arith.constant 0 : index
    %0 = vector.load %arg2[%c0, %c0_0, %c0_1] : memref<1x8x128xf32, #tpu.memory_space<vmem>>, vector<1x8x128xf32>
    %c0_2 = arith.constant 0 : index
    %c0_3 = arith.constant 0 : index
    %c0_4 = arith.constant 0 : index
    %1 = vector.load %arg3[%c0_2, %c0_3, %c0_4] : memref<1x1x128xf32, #tpu.memory_space<vmem>>, vector<1x1x128xf32>
    %2 = vector.broadcast %1 : vector<1x1x128xf32> to vector<1x8x128xf32>
    %3 = arith.mulf %0, %2 : vector<1x8x128xf32>
    %c0_5 = arith.constant 0 : index
    %c0_6 = arith.constant 0 : index
    %c0_7 = arith.constant 0 : index
    %4 = vector.load %arg4[%c0_5, %c0_6, %c0_7] : memref<1x8x128xf32, #tpu.memory_space<vmem>>, vector<1x8x128xf32>
    tpu.vector_store %arg4[%c0_5, %c0_6, %c0_7], %3 {strides = array<i32>} : memref<1x8x128xf32, #tpu.memory_space<vmem>>, vector<1x8x128xf32>,
    return
  }
  func.func @transform_0(%arg0: i32, %arg1: i32) -> (i32, i32, i32) {
    %c0_i32 = arith.constant 0 : i32
    %c0_i32_0 = arith.constant 0 : i32
    return %arg0, %arg1, %c0_i32 : i32, i32, i32
  }
  func.func @transform_1(%arg0: i32, %arg1: i32) -> (i32, i32, i32) {
    %c0_i32 = arith.constant 0 : i32
    %c0_i32_0 = arith.constant 0 : i32
    %c0_i32_1 = arith.constant 0 : i32
    return %arg0, %c0_i32, %c0_i32_0 : i32, i32, i32
  }
  func.func @transform_2(%arg0: i32, %arg1: i32) -> (i32, i32, i32) {
    %c0_i32 = arith.constant 0 : i32
    %c0_i32_0 = arith.constant 0 : i32
    return %arg0, %arg1, %c0_i32 : i32, i32, i32
  }
}

</mosaic_0001>

<bundles_post_ra>
// kernel: tpu_custom_call.1
= control target key start
LH: loop header
LB: loop body
LE: loop exit
PB: predicated region body
PF: predicated region fallthrough
CT: control target
= control target key end

     0   :  { %7 = vsyncpa [#allocation3], 0  ;;  %s798_s0 = inlined_call_operand.hbm [shape: f32[2,8,128], index: 0, kind: input, shape index: {}]   ;;  %s799_s1 = inlined_call_operand.hbm [shape: f32[2,1,128], index: 1, kind: input, shape index: {}]   ;;  %s800_s2 = inlined_call_operand.hbm [shape: f32[2,8,128], index: 2, kind: output, shape index: {}]  }
   0x1   :  { %9 = vsyncpa [#allocation3 + $0x1], 0 }
   0x2   :  { %10 = vsyncpa [#allocation6], 0 }
   0x3   :  { %12 = vsyncpa [#allocation6 + $0x1], 0 }
   0x4   :  { %13 = vsyncpa [#allocation4], 0 }
   0x5   :  { %15 = vsyncpa [#allocation4 + $0x1], 0  ;;  %s583_s9 = smov 0   ;;  %s585_s10 = smov 0  }
   0x6   :  { %s587_s11 = smov 0   ;;  %s589_s12 = smov 0  }
   0x7   :  { %s591_s13 = smov 0   ;;  %s593_s14 = smov 0  }
   0x8 LB: > { %s335_s15 = sadd.s32 4294967295, %s563_s14   ;;  %s336_s16 = sadd.s32 4294967294, %s563_s14   ;;  %s563_s14 = sphi %s593_s14, %s21_s14   ;;  %s559_s13 = sphi %s591_s13, %s820_s13   ;;  %s555_s12 = sphi %s589_s12, %s819_s12   ;;  %s551_s11 = sphi %s587_s11, %s818_s11   ;;  %s547_s10 = sphi %s585_s10, %s817_s10   ;;  %s543_s9 = sphi %s583_s9, %s816_s9  }
   0x9   : > { %s33_s17 = sadd.s32 1, %s559_s13  ;;  %s42_s18 = sadd.s32 1, %s551_s11 }
   0xa   : > { %p35_p0 = scmp.ge.s32.totalorder %s33_s17, 2  ;;  %p49_p1 = scmp.ne.s32.totalorder %s551_s11, %s547_s10 }
   0xb   : > { %p50_p2 = scmp.eq.s32.totalorder %s563_s14, 0  ;;  %p55_p3 = scmp.ne.s32.totalorder %s547_s10, %s543_s9 }
   0xc   : > { %s822_s17 = smov (%p35_p0, %s33_s17), 0  ;;  %p56_p5 = scmp.eq.s32.totalorder %s335_s15, 0 }
   0xd   : > { %p624_p4 = por %p50_p2, %p49_p1  ;;  %s37_s20 = ssub.s32 %s559_s13, %s822_s17 }
   0xe   : > { %p107_p6 = scmp.eq.s32.totalorder %s335_s15, 1  ;;  %p40_p7 = scmp.eq.s32.totalorder %s37_s20, 0 }
   0xf   : > { %p630_p8 = por %p56_p5, %p55_p3  ;;  %p113_p10 = scmp.eq.s32.totalorder %s336_s16, 1 }
  0x10   : > { %p634_p9 = por %p107_p6, %p49_p1  ;;  %p367_p13 = scmp.lt.s32.totalorder %s563_s14, 2 }
  0x11   : > { %s804_s21 = scalar_select %p630_p8, 1, 0 }
  0x12   : > { %s805_s22 = scalar_select %p634_p9, 1, 0 }
  0x13   : > { %s639_s23 = scalar_select %p40_p7, %s551_s11, %s42_s18  }
  0x14   : > { %p641_p11 = por %p113_p10, %p55_p3  ;;  %s648_s25 = sand.u32 1, %s551_s11  }
  0x15   : > { %s339_s26 = sshll.u32 %s648_s25, 3  ;;  %s340_s27 = sshll.u32 %s559_s13, 7 }
  0x16   : > { %s806_s24 = scalar_select %p641_p11, 1, 0 }
  0x17   : > { %s655_s30 = scalar_lea.hbm %s798_s0, %s340_s27  ;;  %s137_s3 = scalar_lea.vmem [#allocation2], %s339_s26 }
  0x18   : > { %s145_s4 = sshll.u32 %s137_s3, 4  ;;  %p661_p0 = pnand %p367_p13, %p624_p4  ;;  %s657_s4 = int_to_ptr.vmem [resolvable:$true] %s145_s4 }
  0x19   : > { %s134_s6 = scalar_lea.sflag [#allocation3], %s648_s25  ;;  %s417_s7 = scalar_lea.hbm %s655_s30, 128 }
  0x1a   : > { %p418_p3 = scmp.ne.s32.totalorder %s655_s30, %s417_s7  ;;  %p419_p5 = pneg %p661_p0 }
  0x1b   : > { %s422_s16 = scalar_lea.hbm %s798_s0, 256  ;;  %p423_p4 = scmp.lt.u32.totalorder %s655_s30, %s798_s0 }
  0x1c   : > { %p420_p6 = pnand %p419_p5, %p418_p3  ;;  %p424_p10 = scmp.lt.u32.totalorder %s422_s16, %s417_s7 }
  0x1d   : > { %p426_p12 = scmp.lt.u32.totalorder %s417_s7, %s655_s30 }
  0x1e   : > { %p421_p7 = pneg %p420_p6  ;;  %p425_p13 = por %p424_p10, %p423_p4 }
  0x20   : > { %p427_p1 = por %p426_p12, %p425_p13 }
  0x22   : > { %p428_p2 = pnand %p427_p1, %p421_p7 }
  0x24   : > { %431 = shalt.err (!%p428_p2)
}
  0x25   : > { %s432_s20 = scalar_lea.vmem %s657_s4, 128  ;;  %s565_s26 = smov [#allocation2]  }
  0x26   : > { %p433_p3 = scmp.ne.s32.totalorder %s657_s4, %s432_s20  ;;  %s437_s27 = sshll.u32 %s565_s26, 4  ;;  %s438_s27 = int_to_ptr.vmem [resolvable:$false] %s437_s27 }
  0x27   : > { %s439_s28 = scalar_lea.vmem %s438_s27, 256  ;;  %p440_p9 = scmp.lt.s32.totalorder %s657_s4, %s438_s27 }
  0x28   : > { %p435_p6 = pnand %p433_p3, %p419_p5  ;;  %p441_p4 = scmp.lt.s32.totalorder %s439_s28, %s432_s20 }
  0x2a   : > { %p436_p11 = pneg %p435_p6  ;;  %p442_p10 = por %p441_p4, %p440_p9 }
  0x2c   : > { %p443_p12 = pnand %p442_p10, %p436_p11 }
  0x2e   : > { %446 = shalt.err (!%p443_p12)
}
  0x2f   : > { %359 = dma.hbm_to_vmem [thread:$0]  (!%p661_p0), %s655_s30, 128, %s657_s4, %s134_s6  }
  0x30   : > { %p808_p1 = scmp.lt.s32.totalorder %s563_s14, 3  ;;  %p809_p2 = scmp.ge.s32.totalorder %s563_s14, 1 }
  0x31   : > { %s341_s3 = sshll.u32 %s559_s13, 4  ;;  %s155_s7 = scalar_lea.vmem [#allocation5], %s648_s25 }
  0x32   : > { %p697_p7 = pnand %p809_p2, %p808_p1  ;;  %s162_s8 = sshll.u32 %s155_s7, 4  ;;  %s163_s8 = int_to_ptr.vmem [resolvable:$true] %s162_s8 }
  0x33   : > { %s706_s18 = scalar_lea.hbm %s799_s1, %s341_s3  ;;  %s153_s30 = scalar_lea.sflag [#allocation6], %s648_s25 }
  0x34   : > { %s810_s29 = scalar_select %p697_p7, 1, 0 }
  0x35   : > { %s447_s4 = scalar_lea.hbm %s706_s18, 16  ;;  %s452_s20 = scalar_lea.hbm %s799_s1, 32 }
  0x36   : > { %p448_p9 = scmp.ne.s32.totalorder %s706_s18, %s447_s4  ;;  %p453_p3 = scmp.lt.u32.totalorder %s706_s18, %s799_s1 }
  0x37   : > { %p454_p6 = scmp.lt.u32.totalorder %s452_s20, %s447_s4  ;;  %p456_p10 = scmp.lt.u32.totalorder %s447_s4, %s706_s18 }
  0x38   : > { %p450_p11 = pnand %p448_p9, %p419_p5 }
  0x39   : > { %p455_p4 = por %p454_p6, %p453_p3 }
  0x3a   : > { %p451_p13 = pneg %p450_p11 }
  0x3b   : > { %p457_p12 = por %p456_p10, %p455_p4 }
  0x3d   : > { %p458_p1 = pnand %p457_p12, %p451_p13 }
  0x3f   : > { %461 = shalt.err (!%p458_p1)
}
  0x40   : > { %s462_s25 = scalar_lea.vmem %s163_s8, 16  ;;  %s566_s28 = smov [#allocation5]  }
  0x41   : > { %p463_p2 = scmp.ne.s32.totalorder %s163_s8, %s462_s25  ;;  %s467_s3 = sshll.u32 %s566_s28, 4  ;;  %s468_s3 = int_to_ptr.vmem [resolvable:$false] %s467_s3 }
  0x42   : > { %s469_s7 = scalar_lea.vmem %s468_s3, 32  ;;  %p470_p8 = scmp.lt.s32.totalorder %s163_s8, %s468_s3 }
  0x43   : > { %p465_p9 = pnand %p463_p2, %p419_p5  ;;  %p471_p7 = scmp.lt.s32.totalorder %s469_s7, %s462_s25 }
  0x45   : > { %p466_p11 = pneg %p465_p9  ;;  %p472_p3 = por %p471_p7, %p470_p8 }
  0x47   : > { %p473_p6 = pnand %p472_p3, %p466_p11 }
  0x49   : > { %476 = shalt.err (!%p473_p6)
}
  0x4a   : > { %362 = dma.hbm_to_vmem [thread:$0]  (!%p661_p0), %s706_s18, 16, %s163_s8, %s153_s30  }
  0x4b   : > { %p811_p13 = scmp.ne.s32.totalorder %s810_s29, 0 }
  0x4c   : > { %s731_s15 = sand.u32 (!%p811_p13), 1, %s547_s10   ;;  %p812_p5 = scmp.ne.s32.totalorder (!%p811_p13), %s804_s21, 0 }
  0x4d   : > { %171 = sbr.rel (%p811_p13) target bundleno = 113 (0x71), region = 28  ;;  %s343_s16 = sshll.u32 (!%p811_p13), %s731_s15, 3 }
  0x4e   : > { %s174_s4 = scalar_lea.sflag (!%p811_p13), [#allocation3], %s731_s15  ;;  %s177_s6 = scalar_lea.vmem (!%p811_p13), [#allocation2], %s343_s16 }
  0x54   : > { %530 = dma.done.wait (%p812_p5), %s174_s4, 128  }
  0x55   : > { %532 = vsyncadd (%p812_p5), %s174_s4, 4294967168  ;;  %s183_s5 = scalar_lea.sflag [#allocation6], %s731_s15  ;;  %s185_s29 = scalar_lea.vmem [#allocation5], %s731_s15 }
  0x56   : > { %534 = dma.done.wait (%p812_p5), %s183_s5, 16  }
  0x57   : > { %536 = vsyncadd (%p812_p5), %s183_s5, 4294967280  ;;  %s209_s8 = scalar_lea.vmem [#allocation7], %s343_s16  ;;  %s347_s30 = sshll.u32 %s555_s12, 7  ;;  %v210_v0 = vld [vmem:[%s177_s6] sm:$0xff] }
  0x58   : > { %s235_s18 = sshll.u32 %s209_s8, 4  ;;  %v345_v1 = vld [vmem:[%s185_s29] ss:$0 sm:$0xff]  ;;  %s751_s26 = scalar_lea.hbm %s800_s2, %s347_s30  ;;  %s746_s18 = int_to_ptr.vmem [resolvable:$true] %s235_s18 }
  0x59   : > { %v218_v2 = vmul.f32 %v345_v1, %v210_v0  ;;  %s221_s21 = scalar_lea.sflag [#allocation4], %s731_s15  ;;  %s477_s27 = scalar_lea.vmem %s746_s18, 128 }
  0x5a   : > { %p478_p8 = scmp.ne.s32.totalorder %s746_s18, %s477_s27  ;;  %p813_p0 = scmp.ne.s32.totalorder %s805_s22, 0 }
  0x5b   : > { %219 = vst [vmem:[%s209_s8] sm:$0xff] %v218_v2  ;;  %s567_s12 = smov [#allocation7]  }
  0x5c   : > { %p479_p7 = pnand %p478_p8, %p813_p0  ;;  %s481_s25 = sshll.u32 %s567_s12, 4  ;;  %s482_s25 = int_to_ptr.vmem [resolvable:$false] %s481_s25 }
  0x5d   : > { %s483_s28 = scalar_lea.vmem %s482_s25, 256  ;;  %p484_p10 = scmp.lt.s32.totalorder %s746_s18, %s482_s25 }
  0x5e   : > { %p480_p4 = pneg %p479_p7  ;;  %p485_p12 = scmp.lt.s32.totalorder %s483_s28, %s477_s27 }
  0x60   : > { %p486_p1 = por %p485_p12, %p484_p10 }
  0x62   : > { %p487_p2 = pnand %p486_p1, %p480_p4 }
  0x64   : > { %490 = shalt.err (!%p487_p2)
}
  0x65   : > { %s491_s3 = scalar_lea.hbm %s751_s26, 128  ;;  %s495_s16 = scalar_lea.hbm %s800_s2, 256 }
  0x66   : > { %p492_p9 = scmp.ne.s32.totalorder %s751_s26, %s491_s3  ;;  %p496_p6 = scmp.lt.u32.totalorder %s751_s26, %s800_s2 }
  0x67   : > { %p497_p13 = scmp.lt.u32.totalorder %s495_s16, %s491_s3  ;;  %p499_p8 = scmp.lt.u32.totalorder %s491_s3, %s751_s26 }
  0x68   : > { %p493_p11 = pnand %p492_p9, %p813_p0 }
  0x69   : > { %p498_p5 = por %p497_p13, %p496_p6 }
  0x6a   : > { %p494_p3 = pneg %p493_p11 }
  0x6b   : > { %p500_p7 = por %p499_p8, %p498_p5 }
  0x6d   : > { %p501_p4 = pnand %p500_p7, %p494_p3 }
  0x6f   : > { %504 = shalt.err (!%p501_p4)
}
  0x70   : > { %354 = dma.vmem_to_hbm [thread:$0]  (%p813_p0), %s746_s18, 128, %s751_s26, %s221_s21  }
  0x71 PF: > { %s247_s5 = sand.u32 1, %s543_s9   ;;  %p814_p10 = scmp.ne.s32.totalorder %s806_s24, 0 }
  0x72   : > { %p815_p12 = scmp.ge.s32.totalorder %s563_s14, 2  ;;  %s248_s29 = scalar_lea.sflag [#allocation4], %s247_s5 }
  0x74   : > { %p364_p1 = pnand %p815_p12, %p814_p10 }
  0x76   : > { %538 = dma.done.wait (!%p364_p1), %s248_s29, 128  }
  0x77   : > { %540 = vsyncadd (!%p364_p1), %s248_s29, 4294967168  ;;  %s21_s14 = sadd.s32 1, %s563_s14   ;;  %s816_s9 = smov %s547_s10 }
  0x78   : > { %p18_p2 = scmp.ge.s32.totalorder %s21_s14, 4   ;;  %s817_s10 = smov %s551_s11 }
  0x79   : > { %s818_s11 = smov %s639_s23  ;;  %s819_s12 = smov %s559_s13 }
  0x7a   : > { %s820_s13 = smov %s822_s17  ;;  %20 = sbr.rel (!%p18_p2) target bundleno = 8 (0x8), region = 86 }
  0x81   :  { %253 = vsyncpa [#allocation3], 1 }
  0x82   :  { %255 = vsyncpa [#allocation3 + $0x1], 1 }
  0x83   :  { %256 = vsyncpa [#allocation6], 1 }
  0x84   :  { %258 = vsyncpa [#allocation6 + $0x1], 1 }
  0x85   :  { %259 = vsyncpa [#allocation4], 1 }
  0x86   :  { %261 = vsyncpa [#allocation4 + $0x1], 1 }

</bundles_post_ra>
